<compile_context>
chip_gen: v5e
topology: v5e:2x2
jax: 0.10.0
libtpu: 0.0.40
codegen_flags: <defaults>
</compile_context>

<pallas_src>
import functools

import jax
import jax.numpy as jnp
from jax.experimental import pallas as pl
from jax.experimental.pallas import tpu as pltpu

EPS = 1e-5


def _round_up(x, m):
    return (x + m - 1) // m * m


def _vmem_need(b_pad, tk, tp, wbytes, n_wbuf):
    """Rough per-core VMEM working-set estimate in bytes."""
    return (2 * b_pad * tk * 4             # x1 tiles (double-buffered, f32)
            + n_wbuf * tk * tp * wbytes    # w_eff tiles (bf16 when use_bf16)
            + b_pad * tp * 4               # K-accumulator scratch
            + b_pad * tp * 4               # finalize temporaries headroom
            + 2 * (2 * tk + 3 * tp) * 4    # BN / w4 parameter tiles (tiny)
            + (2 << 20))                   # output + misc slack


def _pick_tiles(b_pad, n, p, budget, wbytes, n_wbuf):
    """Largest (tk, tp) multiples of 128 whose working set fits the VMEM budget."""
    tk = _round_up(n, 128)
    tp = _round_up(p, 128)

    def shrink(t):
        return max(128, (t // 2) // 128 * 128)

    while _vmem_need(b_pad, tk, tp, wbytes, n_wbuf) > budget:
        if tk >= tp and tk > 128:
            tk = shrink(tk)
        elif tp > 128:
            tp = shrink(tp)
        elif tk > 128:
            tk = shrink(tk)
        else:
            break
    return tk, tp


def pathexpsurv_kernel(b_real, n_real, inv_b, use_bf16,
                       x1_ref, w_ref, g_in_ref, b_in_ref,
                       g_p_ref, b_p_ref, w4p_ref,
                       out_ref, acc_ref):
    k = pl.program_id(1)
    tk = x1_ref.shape[1]

    @pl.when(k == 0)
    def _init():
        acc_ref[...] = jnp.zeros_like(acc_ref)

    # --- bn_input on this K-block (training-mode batch stats). Batch/K tails are
    #     handled with a select mask (jnp.where: NaN-safe against undefined OOB
    #     block data) so x1 never has to be padded/copied in HBM. Moments are
    #     shifted by the first (real) row for better one-pass f32 precision. ---
    raw = x1_ref[...]
    rows = jax.lax.broadcasted_iota(jnp.int32, (raw.shape[0], 1), 0)
    cols = jax.lax.broadcasted_iota(jnp.int32, (1, tk), 1) + k * tk
    valid = (rows < b_real) & (cols < n_real)
    x1 = jnp.where(valid, raw, 0.0)

    x0 = x1[0:1, :]                                   # row 0 is always a real row
    xs = jnp.where(valid, x1 - x0, 0.0)
    mu_s = jnp.sum(xs, axis=0, keepdims=True) * inv_b
    var = jnp.maximum(jnp.sum(xs * xs, axis=0, keepdims=True) * inv_b - mu_s * mu_s, 0.0)
    mu = x0 + mu_s
    xn = (x1 - mu) * jax.lax.rsqrt(var + EPS) * g_in_ref[...] + b_in_ref[...]

    # --- single fused sc1/sc2 matmul (w_eff pre-combined & pre-cast in HBM) ---
    if use_bf16:
        xn = xn.astype(jnp.bfloat16)                  # w_ref is already bf16
    acc_ref[...] += jnp.dot(xn, w_ref[...], preferred_element_type=jnp.float32)

    # --- finalize this P tile: pathway BN + tanh + partial sc4 lane reduction ---
    @pl.when(k == pl.num_programs(1) - 1)
    def _finalize():
        h = acc_ref[...]
        rmask = jax.lax.broadcasted_iota(jnp.int32, (h.shape[0], 1), 0) < b_real
        h0 = h[0:1, :]
        hs = jnp.where(rmask, h - h0, 0.0)
        mu_ps = jnp.sum(hs, axis=0, keepdims=True) * inv_b
        var_p = jnp.maximum(jnp.sum(hs * hs, axis=0, keepdims=True) * inv_b
                            - mu_ps * mu_ps, 0.0)
        mu_p = h0 + mu_ps
        hn = (h - mu_p) * jax.lax.rsqrt(var_p + EPS) * g_p_ref[...] + b_p_ref[...]
        h_t = jnp.tanh(hn)
        # Partial sc4 over this P tile: VPU multiply + cross-lane sum. The x_2
        # column and the final tanh are finished in the wrapper (tiny epilogue),
        # keeping the P grid axis fully parallel across cores.
        out_ref[...] = jnp.sum(h_t * w4p_ref[...], axis=-1, keepdims=True)


def pathexpsurv_forward(x1, x2, pathway_mask, w1, w2,
                        g_in, b_in, g_p, b_p, w4, beta,
                        *, use_bf16=True, vmem_budget_frac=0.75):
    """x1: (B, In_Nodes), x2: (B, 1); weights in PyTorch Linear layout.
    pathway_mask/w1/w2: (Pathway_Nodes, In_Nodes); w4: (1, Pathway_Nodes + 1).
    Returns (B, 1) float32."""
    f32 = jnp.float32
    B, N = x1.shape
    P = pathway_mask.shape[0]
    B_pad = _round_up(B, 8)

    # ---- effective sc1/sc2 weight, combined ONCE (beta traced -> no recompile) ----
    beta = jnp.asarray(beta, f32)
    w_eff = (jnp.maximum(w1, 0.0) * pathway_mask
             + beta * jnp.maximum(w2, 0.0) * (1.0 - pathway_mask)).T   # (N, P)

    # Weight stream dtype: pre-cast to bf16 in HBM so DMA bytes are halved.
    wdtype = jnp.bfloat16 if use_bf16 else f32
    wbytes = 2 if use_bf16 else 4

    # ---- VMEM-budget-derived tiles (128 MiB on v5e/v6e, 64 MiB on v7x) ----
    try:
        vmem_cap = int(pltpu.get_tpu_info().vmem_capacity_bytes)
    except Exception:
        vmem_cap = 64 * 1024 * 1024        # conservative (v7x-sized) fallback
    budget = int(vmem_cap * vmem_budget_frac)

    n_wbuf = 2
    tk, tp = _pick_tiles(B_pad, N, P, budget, wbytes, n_wbuf)
    nk = -(-N // tk)
    P_pad = _round_up(P, tp)
    n_ptiles = P_pad // tp
    N_padk = nk * tk

    # Deepen the weight pipeline only when the per-step matmul is short (small
    # batch -> weight DMA exposed) and a 3rd buffer still fits the budget.
    if nk >= 3 and B_pad <= 256 and _vmem_need(B_pad, tk, tp, wbytes, 3) <= budget:
        n_wbuf = 3

    need = _vmem_need(B_pad, tk, tp, wbytes, n_wbuf)
    vmem_limit = int(min(int(0.9 * vmem_cap), max(2 * need, 32 * 1024 * 1024)))

    # ---- small/parameter arrays: cheap to pad; zeros keep the math exact ----
    x1 = x1.astype(f32)                    # NOT padded: tails are masked in-kernel
    w_p = jnp.zeros((N_padk, P_pad), wdtype).at[:N, :P].set(w_eff.astype(wdtype))
    g_in_p = jnp.ones((1, N_padk), f32).at[0, :N].set(g_in.astype(f32))
    b_in_p = jnp.zeros((1, N_padk), f32).at[0, :N].set(b_in.astype(f32))
    g_p_p = jnp.ones((1, P_pad), f32).at[0, :P].set(g_p.astype(f32))
    b_p_p = jnp.zeros((1, P_pad), f32).at[0, :P].set(b_p.astype(f32))
    w4row = jnp.zeros((1, P_pad), f32).at[0, :P].set(w4[0, :P].astype(f32))

    kernel = functools.partial(pathexpsurv_kernel, B, N, 1.0 / B, use_bf16)

    if n_wbuf != 2:
        try:
            w_spec = pl.BlockSpec((tk, tp), lambda j, k: (k, j),
                                  pipeline_mode=pl.Buffered(n_wbuf))
        except TypeError:                  # fall back to default double-buffering
            w_spec = pl.BlockSpec((tk, tp), lambda j, k: (k, j))
    else:
        w_spec = pl.BlockSpec((tk, tp), lambda j, k: (k, j))

    cost = pl.CostEstimate(
        flops=int(2 * B * N * P),
        transcendentals=int(2 * B * P),
        bytes_accessed=int(4 * B * N + wbytes * N * P + 4 * B * P))

    partials = pl.pallas_call(
        kernel,
        out_shape=jax.ShapeDtypeStruct((n_ptiles, B_pad, 1), jnp.float32),
        grid=(n_ptiles, nk),               # (P tiles "parallel", K "arbitrary")
        in_specs=[
            pl.BlockSpec((B_pad, tk), lambda j, k: (0, k)),   # x1 K-block (unpadded)
            w_spec,                                           # w_eff (tk, tp) block
            pl.BlockSpec((1, tk), lambda j, k: (0, k)),       # bn_input gamma
            pl.BlockSpec((1, tk), lambda j, k: (0, k)),       # bn_input beta
            pl.BlockSpec((1, tp), lambda j, k: (0, j)),       # bn gamma
            pl.BlockSpec((1, tp), lambda j, k: (0, j)),       # bn beta
            pl.BlockSpec((1, tp), lambda j, k: (0, j)),       # w4 pathway row
        ],
        out_specs=pl.BlockSpec((None, B_pad, 1), lambda j, k: (j, 0, 0)),
        scratch_shapes=[pltpu.VMEM((B_pad, tp), jnp.float32)],
        compiler_params=pltpu.CompilerParams(
            dimension_semantics=("parallel", "arbitrary"),
            vmem_limit_bytes=vmem_limit),
        cost_estimate=cost,
    )(x1, w_p, g_in_p, b_in_p, g_p_p, b_p_p, w4row)

    # Tiny epilogue: sum P-tile partials, add the x_2 column of sc4, final tanh.
    lin = jnp.sum(partials, axis=0)[:B] + x2.astype(f32) * w4[0, P].astype(f32)
    return jnp.tanh(lin)


def _reference_forward(x1, x2, pathway_mask, w1, w2, g_in, b_in, g_p, b_p, w4, beta):
    """Pure-JAX reference matching the PyTorch forward."""
    def bn(x, g, b):
        mu = jnp.mean(x, axis=0, keepdims=True)
        var = jnp.mean((x - mu) ** 2, axis=0, keepdims=True)
        return (x - mu) / jnp.sqrt(var + EPS) * g + b

    w1m = jnp.maximum(w1, 0.0) * pathway_mask
    w2m = jnp.maximum(w2, 0.0) * (1.0 - pathway_mask)
    xn = bn(x1, g_in, b_in)
    h = xn @ w1m.T + beta * (xn @ w2m.T)
    h_t = jnp.tanh(bn(h, g_p, b_p))
    x_cat = jnp.concatenate([h_t, x2], axis=1)
    return jnp.tanh(x_cat @ w4.T)


if __name__ == "__main__":
    # Deliberately non-aligned small shapes to exercise the batch/K tail masking.
    B, In_Nodes, Pathway_Nodes = 10, 37, 19
    beta = jnp.float32(0.5)

    key = jax.random.PRNGKey(0)
    k_x1, k_x2, k_mask, k_w1, k_w2, k_w4 = jax.random.split(key, 6)

    x1 = jax.random.normal(k_x1, (B, In_Nodes), dtype=jnp.float32)
    x2 = jax.random.normal(k_x2, (B, 1), dtype=jnp.float32)

    pathway_mask = jax.random.bernoulli(
        k_mask, 0.5, (Pathway_Nodes, In_Nodes)).astype(jnp.float32)

    bound1 = 1.0 / jnp.sqrt(jnp.float32(In_Nodes))
    w1 = jax.random.uniform(k_w1, (Pathway_Nodes, In_Nodes),
                            minval=-bound1, maxval=bound1, dtype=jnp.float32)
    w2 = jax.random.uniform(k_w2, (Pathway_Nodes, In_Nodes),
                            minval=-bound1, maxval=bound1, dtype=jnp.float32)
    w4 = jax.random.uniform(k_w4, (1, Pathway_Nodes + 1),
                            minval=-0.001, maxval=0.001, dtype=jnp.float32)

    # BatchNorm affine params at PyTorch init values.
    g_in = jnp.ones((In_Nodes,), jnp.float32)
    b_in = jnp.zeros((In_Nodes,), jnp.float32)
    g_p = jnp.ones((Pathway_Nodes,), jnp.float32)
    b_p = jnp.zeros((Pathway_Nodes,), jnp.float32)

    ref = _reference_forward(x1, x2, pathway_mask, w1, w2,
                             g_in, b_in, g_p, b_p, w4, beta)

    # Exact path (f32 GEMM) — tight tolerance against the f32 reference.
    out_f32 = jax.block_until_ready(
        pathexpsurv_forward(x1, x2, pathway_mask, w1, w2,
                            g_in, b_in, g_p, b_p, w4, beta, use_bf16=False))
    assert out_f32.shape == (B, 1)
    assert jnp.allclose(out_f32, ref, atol=1e-5, rtol=1e-5)

    # Default fast path (bf16 weight DMA + bf16 MXU inputs, f32 accumulation) —
    # tolerance relaxed per the bf16 GEMM rounding (review correctness note).
    out_bf16 = jax.block_until_ready(
        pathexpsurv_forward(x1, x2, pathway_mask, w1, w2,
                            g_in, b_in, g_p, b_p, w4, beta, use_bf16=True))
    assert out_bf16.shape == (B, 1)
    assert jnp.allclose(out_bf16, ref, atol=2e-3, rtol=5e-2)

    print("KERNEL_OK")
</pallas_src>

<mosaic_0001>
module attributes {stable_mosaic.version = 11 : i64} {
  func.func @pathexpsurv_kernel(%arg0: i32, %arg1: i32, %arg2: memref<16x128xf32, #tpu.memory_space<vmem>>, %arg3: memref<128x128xf32, #tpu.memory_space<vmem>>, %arg4: memref<1x128xf32, #tpu.memory_space<vmem>>, %arg5: memref<1x128xf32, #tpu.memory_space<vmem>>, %arg6: memref<1x128xf32, #tpu.memory_space<vmem>>, %arg7: memref<1x128xf32, #tpu.memory_space<vmem>>, %arg8: memref<1x128xf32, #tpu.memory_space<vmem>>, %arg9: memref<1x16x1xf32, #tpu.memory_space<vmem>>, %arg10: memref<16x128xf32, #tpu.memory_space<vmem>>) attributes {dimension_semantics = [#tpu.dimension_semantics<parallel>, #tpu.dimension_semantics<arbitrary>], iteration_bounds = array<i64: 1, 1>, scalar_prefetch = 0 : i64, scratch_operands = 1 : i64, tpu.core_type = #tpu.core_type<tc>, window_params = [{transform_indices = @transform_0, window_bounds = array<i64: 16, 128>}, {transform_indices = @transform_1, window_bounds = array<i64: 128, 128>}, {transform_indices = @transform_2, window_bounds = array<i64: 1, 128>}, {transform_indices = @transform_3, window_bounds = array<i64: 1, 128>}, {transform_indices = @transform_4, window_bounds = array<i64: 1, 128>}, {transform_indices = @transform_5, window_bounds = array<i64: 1, 128>}, {transform_indices = @transform_6, window_bounds = array<i64: 1, 128>}, {transform_indices = @transform_7, window_bounds = array<i64: 1, 16, 1>}]} {
    %c0_i32 = arith.constant 0 : i32
    %0 = arith.cmpi eq, %arg1, %c0_i32 : i32
    %1 = arith.extui %0 : i1 to i32
    %c0_i32_0 = arith.constant 0 : i32
    %2 = arith.cmpi ne, %1, %c0_i32_0 : i32
    scf.if %2 {
      %cst_22 = arith.constant 0.000000e+00 : f32
      %58 = vector.broadcast %cst_22 : f32 to vector<16x128xf32>
      %c0_23 = arith.constant 0 : index
      %c0_24 = arith.constant 0 : index
      %59 = vector.load %arg10[%c0_23, %c0_24] : memref<16x128xf32, #tpu.memory_space<vmem>>, vector<16x128xf32>
      tpu.vector_store %arg10[%c0_23, %c0_24], %58 {strides = array<i32>} : memref<16x128xf32, #tpu.memory_space<vmem>>, vector<16x128xf32>,
    } else {
    }
    %c0 = arith.constant 0 : index
    %c0_1 = arith.constant 0 : index
    %3 = vector.load %arg2[%c0, %c0_1] : memref<16x128xf32, #tpu.memory_space<vmem>>, vector<16x128xf32>
    %4 = tpu.iota {dimensions = array<i32: 0>} : vector<16x1xi32>
    %5 = tpu.iota {dimensions = array<i32: 1>} : vector<1x128xi32>
    %c128_i32 = arith.constant 128 : i32
    %6 = arith.muli %arg1, %c128_i32 : i32
    %7 = vector.broadcast %6 : i32 to vector<1x128xi32>
    %8 = arith.addi %5, %7 : vector<1x128xi32>
    %c10_i32 = arith.constant 10 : i32
    %9 = vector.broadcast %c10_i32 : i32 to vector<16x1xi32>
    %10 = arith.cmpi slt, %4, %9 : vector<16x1xi32>
    %c37_i32 = arith.constant 37 : i32
    %11 = vector.broadcast %c37_i32 : i32 to vector<1x128xi32>
    %12 = arith.cmpi slt, %8, %11 : vector<1x128xi32>
    %13 = vector.broadcast %10 : vector<16x1xi1> to vector<16x128xi1>
    %14 = vector.broadcast %12 : vector<1x128xi1> to vector<16x128xi1>
    %15 = arith.andi %13, %14 : vector<16x128xi1>
    %cst = arith.constant 0.000000e+00 : f32
    %16 = vector.broadcast %cst : f32 to vector<16x128xf32>
    %17 = arith.select %15, %3, %16 : vector<16x128xi1>, vector<16x128xf32>
    %18 = vector.extract_strided_slice %17 {offsets = [0, 0], sizes = [1, 128], strides = [1, 1]} : vector<16x128xf32> to vector<1x128xf32>
    %19 = vector.broadcast %18 : vector<1x128xf32> to vector<16x128xf32>
    %20 = arith.subf %17, %19 : vector<16x128xf32>
    %cst_2 = arith.constant 0.000000e+00 : f32
    %21 = vector.broadcast %cst_2 : f32 to vector<16x128xf32>
    %22 = arith.select %15, %20, %21 : vector<16x128xi1>, vector<16x128xf32>
    %cst_3 = arith.constant dense<0.000000e+00> : vector<128xf32>
    %23 = vector.multi_reduction <add>, %22, %cst_3 [0] : vector<16x128xf32> to vector<128xf32>
    %24 = vector.shape_cast %23 : vector<128xf32> to vector<1x128xf32>
    %cst_4 = arith.constant 1.000000e-01 : f32
    %25 = vector.broadcast %cst_4 : f32 to vector<1x128xf32>
    %26 = arith.mulf %24, %25 : vector<1x128xf32>
    %27 = arith.mulf %22, %22 : vector<16x128xf32>
    %cst_5 = arith.constant dense<0.000000e+00> : vector<128xf32>
    %28 = vector.multi_reduction <add>, %27, %cst_5 [0] : vector<16x128xf32> to vector<128xf32>
    %29 = vector.shape_cast %28 : vector<128xf32> to vector<1x128xf32>
    %cst_6 = arith.constant 1.000000e-01 : f32
    %30 = vector.broadcast %cst_6 : f32 to vector<1x128xf32>
    %31 = arith.mulf %29, %30 : vector<1x128xf32>
    %32 = arith.mulf %26, %26 : vector<1x128xf32>
    %33 = arith.subf %31, %32 : vector<1x128xf32>
    %cst_7 = arith.constant 0.000000e+00 : f32
    %34 = vector.broadcast %cst_7 : f32 to vector<1x128xf32>
    %35 = arith.maximumf %33, %34 : vector<1x128xf32>
    %36 = arith.addf %18, %26 : vector<1x128xf32>
    %37 = vector.broadcast %36 : vector<1x128xf32> to vector<16x128xf32>
    %38 = arith.subf %17, %37 : vector<16x128xf32>
    %cst_8 = arith.constant 9.99999974E-6 : f32
    %39 = vector.broadcast %cst_8 : f32 to vector<1x128xf32>
    %40 = arith.addf %35, %39 : vector<1x128xf32>
    %41 = math.rsqrt %40 : vector<1x128xf32>
    %42 = vector.broadcast %41 : vector<1x128xf32> to vector<16x128xf32>
    %43 = arith.mulf %38, %42 : vector<16x128xf32>
    %c0_9 = arith.constant 0 : index
    %c0_10 = arith.constant 0 : index
    %44 = vector.load %arg4[%c0_9, %c0_10] : memref<1x128xf32, #tpu.memory_space<vmem>>, vector<1x128xf32>
    %45 = vector.broadcast %44 : vector<1x128xf32> to vector<16x128xf32>
    %46 = arith.mulf %43, %45 : vector<16x128xf32>
    %c0_11 = arith.constant 0 : index
    %c0_12 = arith.constant 0 : index
    %47 = vector.load %arg5[%c0_11, %c0_12] : memref<1x128xf32, #tpu.memory_space<vmem>>, vector<1x128xf32>
    %48 = vector.broadcast %47 : vector<1x128xf32> to vector<16x128xf32>
    %49 = arith.addf %46, %48 : vector<16x128xf32>
    %c0_13 = arith.constant 0 : index
    %c0_14 = arith.constant 0 : index
    %50 = vector.load %arg10[%c0_13, %c0_14] : memref<16x128xf32, #tpu.memory_space<vmem>>, vector<16x128xf32>
    %c0_15 = arith.constant 0 : index
    %c0_16 = arith.constant 0 : index
    %51 = vector.load %arg3[%c0_15, %c0_16] : memref<128x128xf32, #tpu.memory_space<vmem>>, vector<128x128xf32>
    %cst_17 = arith.constant dense<0.000000e+00> : vector<16x128xf32>
    %52 = tpu.matmul %49, %51, %cst_17 {dimension_numbers = #tpu.dot_dimension_numbers<[1], [0], [0], [1], [0, 0, 1, 1], [], []>} : vector<16x128xf32>, vector<128x128xf32>, vector<16x128xf32> -> vector<16x128xf32>
    %53 = arith.addf %50, %52 : vector<16x128xf32>
    %c0_18 = arith.constant 0 : index
    %c0_19 = arith.constant 0 : index
    %54 = vector.load %arg10[%c0_18, %c0_19] : memref<16x128xf32, #tpu.memory_space<vmem>>, vector<16x128xf32>
    tpu.vector_store %arg10[%c0_18, %c0_19], %53 {strides = array<i32>} : memref<16x128xf32, #tpu.memory_space<vmem>>, vector<16x128xf32>,
    %c0_i32_20 = arith.constant 0 : i32
    %55 = arith.cmpi eq, %arg1, %c0_i32_20 : i32
    %56 = arith.extui %55 : i1 to i32
    %c0_i32_21 = arith.constant 0 : i32
    %57 = arith.cmpi ne, %56, %c0_i32_21 : i32
    scf.if %57 {
      %c0_22 = arith.constant 0 : index
      %c0_23 = arith.constant 0 : index
      %58 = vector.load %arg10[%c0_22, %c0_23] : memref<16x128xf32, #tpu.memory_space<vmem>>, vector<16x128xf32>
      %59 = tpu.iota {dimensions = array<i32: 0>} : vector<16x1xi32>
      %c10_i32_24 = arith.constant 10 : i32
      %60 = vector.broadcast %c10_i32_24 : i32 to vector<16x1xi32>
      %61 = arith.cmpi slt, %59, %60 : vector<16x1xi32>
      %62 = vector.extract_strided_slice %58 {offsets = [0, 0], sizes = [1, 128], strides = [1, 1]} : vector<16x128xf32> to vector<1x128xf32>
      %63 = vector.broadcast %62 : vector<1x128xf32> to vector<16x128xf32>
      %64 = arith.subf %58, %63 : vector<16x128xf32>
      %cst_25 = arith.constant 0.000000e+00 : f32
      %65 = vector.shape_cast %61 : vector<16x1xi1> to vector<16x1xi1>
      %66 = vector.broadcast %65 : vector<16x1xi1> to vector<16x128xi1>
      %67 = vector.broadcast %cst_25 : f32 to vector<16x128xf32>
      %68 = arith.select %66, %64, %67 : vector<16x128xi1>, vector<16x128xf32>
      %cst_26 = arith.constant dense<0.000000e+00> : vector<128xf32>
      %69 = vector.multi_reduction <add>, %68, %cst_26 [0] : vector<16x128xf32> to vector<128xf32>
      %70 = vector.shape_cast %69 : vector<128xf32> to vector<1x128xf32>
      %cst_27 = arith.constant 1.000000e-01 : f32
      %71 = vector.broadcast %cst_27 : f32 to vector<1x128xf32>
      %72 = arith.mulf %70, %71 : vector<1x128xf32>
      %73 = arith.mulf %68, %68 : vector<16x128xf32>
      %cst_28 = arith.constant dense<0.000000e+00> : vector<128xf32>
      %74 = vector.multi_reduction <add>, %73, %cst_28 [0] : vector<16x128xf32> to vector<128xf32>
      %75 = vector.shape_cast %74 : vector<128xf32> to vector<1x128xf32>
      %cst_29 = arith.constant 1.000000e-01 : f32
      %76 = vector.broadcast %cst_29 : f32 to vector<1x128xf32>
      %77 = arith.mulf %75, %76 : vector<1x128xf32>
      %78 = arith.mulf %72, %72 : vector<1x128xf32>
      %79 = arith.subf %77, %78 : vector<1x128xf32>
      %cst_30 = arith.constant 0.000000e+00 : f32
      %80 = vector.broadcast %cst_30 : f32 to vector<1x128xf32>
      %81 = arith.maximumf %79, %80 : vector<1x128xf32>
      %82 = arith.addf %62, %72 : vector<1x128xf32>
      %83 = vector.broadcast %82 : vector<1x128xf32> to vector<16x128xf32>
      %84 = arith.subf %58, %83 : vector<16x128xf32>
      %cst_31 = arith.constant 9.99999974E-6 : f32
      %85 = vector.broadcast %cst_31 : f32 to vector<1x128xf32>
      %86 = arith.addf %81, %85 : vector<1x128xf32>
      %87 = math.rsqrt %86 : vector<1x128xf32>
      %88 = vector.broadcast %87 : vector<1x128xf32> to vector<16x128xf32>
      %89 = arith.mulf %84, %88 : vector<16x128xf32>
      %c0_32 = arith.constant 0 : index
      %c0_33 = arith.constant 0 : index
      %90 = vector.load %arg6[%c0_32, %c0_33] : memref<1x128xf32, #tpu.memory_space<vmem>>, vector<1x128xf32>
      %91 = vector.broadcast %90 : vector<1x128xf32> to vector<16x128xf32>
      %92 = arith.mulf %89, %91 : vector<16x128xf32>
      %c0_34 = arith.constant 0 : index
      %c0_35 = arith.constant 0 : index
      %93 = vector.load %arg7[%c0_34, %c0_35] : memref<1x128xf32, #tpu.memory_space<vmem>>, vector<1x128xf32>
      %94 = vector.broadcast %93 : vector<1x128xf32> to vector<16x128xf32>
      %95 = arith.addf %92, %94 : vector<16x128xf32>
      %96 = math.tanh %95 : vector<16x128xf32>
      %c0_36 = arith.constant 0 : index
      %c0_37 = arith.constant 0 : index
      %97 = vector.load %arg8[%c0_36, %c0_37] : memref<1x128xf32, #tpu.memory_space<vmem>>, vector<1x128xf32>
      %98 = vector.broadcast %97 : vector<1x128xf32> to vector<16x128xf32>
      %99 = arith.mulf %96, %98 : vector<16x128xf32>
      %cst_38 = arith.constant dense<0.000000e+00> : vector<16xf32>
      %100 = vector.multi_reduction <add>, %99, %cst_38 [1] : vector<16x128xf32> to vector<16xf32>
      %101 = vector.shape_cast %100 : vector<16xf32> to vector<16x1xf32>
      %c0_39 = arith.constant 0 : index
      %c0_40 = arith.constant 0 : index
      %c0_41 = arith.constant 0 : index
      %102 = vector.load %arg9[%c0_39, %c0_40, %c0_41] : memref<1x16x1xf32, #tpu.memory_space<vmem>>, vector<1x16x1xf32>
      %103 = vector.shape_cast %102 : vector<1x16x1xf32> to vector<16x1xf32>
      %104 = vector.shape_cast %101 : vector<16x1xf32> to vector<1x16x1xf32>
      tpu.vector_store %arg9[%c0_39, %c0_40, %c0_41], %104 {strides = array<i32>} : memref<1x16x1xf32, #tpu.memory_space<vmem>>, vector<1x16x1xf32>,
    } else {
    }
    return
  }
  func.func @transform_0(%arg0: i32, %arg1: i32) -> (i32, i32) {
    %c0_i32 = arith.constant 0 : i32
    %c0_i32_0 = arith.constant 0 : i32
    return %c0_i32, %arg1 : i32, i32
  }
  func.func @transform_1(%arg0: i32, %arg1: i32) -> (i32, i32) {
    %c0_i32 = arith.constant 0 : i32
    return %arg1, %arg0 : i32, i32
  }
  func.func @transform_2(%arg0: i32, %arg1: i32) -> (i32, i32) {
    %c0_i32 = arith.constant 0 : i32
    %c0_i32_0 = arith.constant 0 : i32
    return %c0_i32, %arg1 : i32, i32
  }
  func.func @transform_3(%arg0: i32, %arg1: i32) -> (i32, i32) {
    %c0_i32 = arith.constant 0 : i32
    %c0_i32_0 = arith.constant 0 : i32
    return %c0_i32, %arg1 : i32, i32
  }
  func.func @transform_4(%arg0: i32, %arg1: i32) -> (i32, i32) {
    %c0_i32 = arith.constant 0 : i32
    %c0_i32_0 = arith.constant 0 : i32
    return %c0_i32, %arg0 : i32, i32
  }
  func.func @transform_5(%arg0: i32, %arg1: i32) -> (i32, i32) {
    %c0_i32 = arith.constant 0 : i32
    %c0_i32_0 = arith.constant 0 : i32
    return %c0_i32, %arg0 : i32, i32
  }
  func.func @transform_6(%arg0: i32, %arg1: i32) -> (i32, i32) {
    %c0_i32 = arith.constant 0 : i32
    %c0_i32_0 = arith.constant 0 : i32
    return %c0_i32, %arg0 : i32, i32
  }
  func.func @transform_7(%arg0: i32, %arg1: i32) -> (i32, i32, i32) {
    %c0_i32 = arith.constant 0 : i32
    %c0_i32_0 = arith.constant 0 : i32
    %c0_i32_1 = arith.constant 0 : i32
    return %arg0, %c0_i32, %c0_i32_0 : i32, i32, i32
  }
}

</mosaic_0001>

<bundles_post_ra>
// kernel: tpu_custom_call.1
= control target key start
LH: loop header
LB: loop body
LE: loop exit
PB: predicated region body
PF: predicated region fallthrough
CT: control target
= control target key end

     0   :  { %12 = vsyncpa [#allocation4], 0  ;;  %s444_s0 = inlined_call_operand.hbm [shape: f32[10,37], index: 0, kind: input, shape index: {}]   ;;  %s445_s1 = inlined_call_operand.hbm [shape: f32[128,128], index: 1, kind: input, shape index: {}]   ;;  %s446_s2 = inlined_call_operand.vmem [shape: f32[1,128], index: 2, kind: input, shape index: {}]   ;;  %s447_s3 = inlined_call_operand.vmem [shape: f32[1,128], index: 3, kind: input, shape index: {}]   ;;  %s448_s4 = inlined_call_operand.vmem [shape: f32[1,128], index: 4, kind: input, shape index: {}]   ;;  %s449_s5 = inlined_call_operand.vmem [shape: f32[1,128], index: 5, kind: input, shape index: {}]   ;;  %s450_s6 = inlined_call_operand.vmem [shape: f32[1,128], index: 6, kind: input, shape index: {}]   ;;  %s451_s7 = inlined_call_operand.vmem [shape: f32[1,16,1], index: 7, kind: output, shape index: {}]  }
   0x1   :  { %s18_s26 = sshll.u32 %s444_s0, 4  ;;  %s19_s26 = int_to_ptr.hbm [resolvable:$true] %s18_s26 }
   0x2   :  { %13 = vsyncpa [#allocation6], 0  ;;  %s353_s27 = smov [#allocation3]   ;;  %s31_s8 = sshll.u32 %s445_s1, 4  ;;  %s32_s8 = int_to_ptr.hbm [resolvable:$true] %s31_s8 }
   0x3   :  { %s20_s28 = sshll.u32 %s353_s27, 4  ;;  %s354_s9 = smov 128   ;;  %s21_s28 = int_to_ptr.vmem [resolvable:$true] %s20_s28 }
   0x4   :  { %s355_s10 = smov 8   ;;  %s356_s11 = smov [#allocation5]  }
   0x5   :  { %26 = dma.hbm_to_vmem [thread:$0]  %s19_s26, 256, %s21_s28, [#allocation4], %s354_s9, %s354_s9, %s355_s10  }
   0x6   :  { %s33_s12 = sshll.u32 %s356_s11, 4  ;;  %s34_s12 = int_to_ptr.vmem [resolvable:$true] %s33_s12 }
   0x7   :  { %39 = dma.hbm_to_vmem [thread:$0]  %s32_s8, 2048, %s34_s12, [#allocation6], %s354_s9, %s354_s9, %s355_s10  }
   0x8   :  { %349 = dma.done.wait [#allocation4], 256  }
   0x9   :  { %350 = vsyncadd [#allocation4], 4294967040 }
   0xa   :  { %351 = dma.done.wait [#allocation6], 2048  }
   0xb   :  { %352 = vsyncadd [#allocation6], 4294965248  ;;  %v66_v0 = vlaneseq  ;;  %v159_v4 = vld [vmem:[#allocation5 + $0x78] sm:$0xff]  ;;  %v158_v5 = vld [vmem:[#allocation5 + $0x70] sm:$0xff]  ;;  %vm259_vm9 = vcmask 7168  }
   0xc   :  { %160 = vmatpush.msra.mxu0 %v159_v4  ;;  %268 = vmatpush.msra.mxu1 %v159_v4  ;;  %v157_v6 = vld [vmem:[#allocation5 + $0x68] sm:$0xff]  ;;  %v156_v7 = vld [vmem:[#allocation5 + $0x60] sm:$0xff]  ;;  %v155_v8 = vld [vmem:[#allocation5 + $0x58] sm:$0xff] }
   0xd   :  { %v67_v1 = vshrl.u32 %v66_v0, 7  ;;  %v70_v3 = vand.u32 127, %v66_v0  ;;  %v64_v9 = vld [vmem:[#allocation3] sm:$0xff]  ;;  %v65_v10 = vld [vmem:[#allocation3 + $0x8] sm:$0xff]  ;;  %v153_v17 = vld [vmem:[#allocation5 + $0x48] sm:$0xff] }
   0xe   :  { %161 = vmatpush.msra.mxu0 %v158_v5  ;;  %269 = vmatpush.msra.mxu1 %v158_v5  ;;  %v154_v14 = vld [vmem:[#allocation5 + $0x50] sm:$0xff]  ;;  %v152_v20 = vld [vmem:[#allocation5 + $0x40] sm:$0xff]  ;;  %v151_v24 = vld [vmem:[#allocation5 + $0x38] sm:$0xff] }
   0xf   :  { %v403_v2 = vadd.s32 8, %v67_v1  ;;  %vm76_vm1 = vcmp.lt.s32.totalorder %v70_v3, 37  ;;  %v150_v27 = vld [vmem:[#allocation5 + $0x30] sm:$0xff]  ;;  %v149_v30 = vld [vmem:[#allocation5 + $0x28] sm:$0xff]  ;;  %v148_v33 = vld [vmem:[#allocation5 + $0x20] sm:$0xff] }
  0x10   :  { %162 = vmatpush.msra.mxu0 %v157_v6  ;;  %270 = vmatpush.msra.mxu1 %v157_v6  ;;  %v410_v11 = vsel %vm76_vm1, %v64_v9, 0.0  ;;  %v147_v36 = vld [vmem:[#allocation5 + $0x18] sm:$0xff]  ;;  %v146_v39 = vld [vmem:[#allocation5 + $0x10] sm:$0xff]  ;;  %v145_v42 = vld [vmem:[#allocation5 + $0x8] sm:$0xff] }
  0x11   :  { %vm75_vm0 = vcmp.lt.s32.totalorder %v403_v2, 10  ;;  %v87_v13 = vperm.slane %v410_v11, 0  ;;  %v144_v45 = vld [vmem:[#allocation5] sm:$0xff]  ;;  %v288_v61 = vld [vmem:[%s446_s2] ss:$0 sm:$0xff] }
  0x12   :  { %vm84_vm2 = vmand %vm75_vm0, %vm76_vm1  ;;  %163 = vmatpush.msra.mxu0 %v156_v7  ;;  %271 = vmatpush.msra.mxu1 %v156_v7  ;;  %v289_v0 = vld [vmem:[%s447_s3] ss:$0 sm:$0xff] }
  0x13   :  { %v412_v12 = vsel %vm84_vm2, %v65_v10, 0.0  ;;  %v88_v15 = vsub.f32 %v410_v11, %v87_v13 }
  0x14   :  { %164 = vmatpush.msra.mxu0 %v155_v8  ;;  %272 = vmatpush.msra.mxu1 %v155_v8  ;;  %v89_v16 = vsub.f32 %v412_v12, %v87_v13 }
  0x15   :  { %v90_v18 = vsel %vm76_vm1, %v88_v15, 0.0 }
  0x16   :  { %165 = vmatpush.msra.mxu0 %v154_v14  ;;  %273 = vmatpush.msra.mxu1 %v154_v14  ;;  %v91_v19 = vsel %vm84_vm2, %v89_v16, 0.0  ;;  %v100_v22 = vmul.f32 %v90_v18, %v90_v18 }
  0x17   :  { %v92_v21 = vadd.f32 %v91_v19, %v90_v18  ;;  %v101_v23 = vmul.f32 %v91_v19, %v91_v19 }
  0x18   :  { %166 = vmatpush.msra.mxu0 %v153_v17  ;;  %274 = vmatpush.msra.mxu1 %v153_v17 }
  0x19   :  { %v93_v25 = vrot.slane %v92_v21, 4  ;;  %v102_v26 = vadd.f32 %v101_v23, %v100_v22 }
  0x1a   :  { %167 = vmatpush.msra.mxu0 %v152_v20  ;;  %275 = vmatpush.msra.mxu1 %v152_v20 }
  0x1b   :  { %v94_v28 = vadd.f32 %v93_v25, %v92_v21  ;;  %v103_v29 = vrot.slane %v102_v26, 4 }
  0x1c   :  { %168 = vmatpush.msra.mxu0 %v151_v24  ;;  %276 = vmatpush.msra.mxu1 %v151_v24 }
  0x1d   :  { %v95_v31 = vrot.slane %v94_v28, 2  ;;  %v104_v32 = vadd.f32 %v103_v29, %v102_v26 }
  0x1e   :  { %169 = vmatpush.msra.mxu0 %v150_v27  ;;  %277 = vmatpush.msra.mxu1 %v150_v27 }
  0x1f   :  { %v96_v34 = vadd.f32 %v95_v31, %v94_v28  ;;  %v105_v35 = vrot.slane %v104_v32, 2 }
  0x20   :  { %170 = vmatpush.msra.mxu0 %v149_v30  ;;  %278 = vmatpush.msra.mxu1 %v149_v30 }
  0x21   :  { %v97_v37 = vrot.slane %v96_v34, 1  ;;  %v106_v38 = vadd.f32 %v105_v35, %v104_v32 }
  0x22   :  { %171 = vmatpush.msra.mxu0 %v148_v33  ;;  %279 = vmatpush.msra.mxu1 %v148_v33 }
  0x23   :  { %v98_v40 = vadd.f32 %v97_v37, %v96_v34  ;;  %v107_v41 = vrot.slane %v106_v38, 1 }
  0x24   :  { %172 = vmatpush.msra.mxu0 %v147_v36  ;;  %280 = vmatpush.msra.mxu1 %v147_v36 }
  0x25   :  { %v99_v43 = vmul.f32 0.1, %v98_v40  ;;  %v108_v44 = vadd.f32 %v107_v41, %v106_v38 }
  0x26   :  { %173 = vmatpush.msra.mxu0 %v146_v39  ;;  %281 = vmatpush.msra.mxu1 %v146_v39 }
  0x27   :  { %v109_v46 = vmul.f32 0.1, %v108_v44  ;;  %v110_v47 = vmul.f32 %v99_v43, %v99_v43  ;;  %v113_v52 = vadd.f32 %v99_v43, %v410_v11  ;;  %v290_v43 = vld [vmem:[%s448_s4] ss:$0 sm:$0xff] }
  0x28   :  { %174 = vmatpush.msra.mxu0 %v145_v42  ;;  %282 = vmatpush.msra.mxu1 %v145_v42 }
  0x29   :  { %v111_v48 = vsub.f32 %v109_v46, %v110_v47  ;;  %v114_v55 = vperm.slane %v113_v52, 0  ;;  %v291_v47 = vld [vmem:[%s449_s5] ss:$0 sm:$0xff] }
  0x2a   :  { %175 = vmatpush.msra.mxu0 %v144_v45  ;;  %283 = vmatpush.msra.mxu1 %v144_v45 }
  0x2b   :  { %v112_v49 = vmax.f32 %v111_v48, 0.0  ;;  %v115_v58 = vsub.f32 %v410_v11, %v114_v55  ;;  %v116_v59 = vsub.f32 %v412_v12, %v114_v55 }
  0x2d   :  { %v117_v50 = vadd.f32 1e-05, %v112_v49 }
  0x2f   :  { %293 = vrsqrt.f32 %v117_v50  ;;  %vm124_vm3 = vweird.f32 %v117_v50 }
  0x35   :  { %v294_v51 = vpop.eup %293 }
  0x36   :  { %v119_v53 = vmul.f32 %v294_v51, %v117_v50  ;;  %vm125_vm4 = vweird.f32 %v294_v51 }
  0x37   :  { %vm126_vm5 = vmor %vm124_vm3, %vm125_vm4 }
  0x38   :  { %v120_v54 = vmul.f32 %v294_v51, %v119_v53  ;;  %v292_v53 = vld [vmem:[%s450_s6] ss:$0 sm:$0xff] }
  0x3a   :  { %v121_v56 = vmul.f32 0.5, %v120_v54 }
  0x3c   :  { %v122_v57 = vsub.f32 1.5, %v121_v56 }
  0x3e   :  { %v123_v60 = vmul.f32 %v294_v51, %v122_v57 }
  0x40   :  { %v127_v62 = vsel %vm126_vm5, %v294_v51, %v123_v60 }
  0x41   :  { %v128_v63 = vmul.f32 %v127_v62, %v115_v58  ;;  %v129_v1 = vmul.f32 %v127_v62, %v116_v59 }
  0x43   :  { %v134_v3 = vmul.f32 %v288_v61, %v128_v63  ;;  %v135_v4 = vmul.f32 %v288_v61, %v129_v1 }
  0x45   :  { %v140_v5 = vadd.f32 %v289_v0, %v134_v3  ;;  %v141_v6 = vadd.f32 %v289_v0, %v135_v4 }
  0x47   :  { %176 = vmatmul.f32.vlgmr.msra.gmra.mxu0 %v140_v5  ;;  %179 = vmatmul.f32.vlgmr.msra.gmra.mxu1 %v141_v6 }
  0xc4   :  { %v177_v7 = vpop.f32.mrf.mxu0  ;;  %v180_v8 = vpop.f32.mrf.mxu1 }
  0xc5   :  { %v192_v9 = vperm.slane %v177_v7, 0 }
  0xc7   :  { %v193_v10 = vsub.f32 %v177_v7, %v192_v9  ;;  %v194_v11 = vsub.f32 %v180_v8, %v192_v9 }
  0xc9   :  { %v196_v12 = vsel %vm75_vm0, %v194_v11, 0.0  ;;  %v205_v13 = vmul.f32 %v193_v10, %v193_v10 }
  0xca   :  { %v197_v14 = vadd.f32 %v196_v12, %v193_v10  ;;  %v206_v15 = vmul.f32 %v196_v12, %v196_v12 }
  0xcc   :  { %v198_v16 = vrot.slane %v197_v14, 4  ;;  %v207_v17 = vadd.f32 %v206_v15, %v205_v13 }
  0xce   :  { %v199_v18 = vadd.f32 %v198_v16, %v197_v14  ;;  %v208_v19 = vrot.slane %v207_v17, 4 }
  0xd0   :  { %v200_v20 = vrot.slane %v199_v18, 2  ;;  %v209_v21 = vadd.f32 %v208_v19, %v207_v17 }
  0xd2   :  { %v201_v22 = vadd.f32 %v200_v20, %v199_v18  ;;  %v210_v23 = vrot.slane %v209_v21, 2 }
  0xd4   :  { %v202_v24 = vrot.slane %v201_v22, 1  ;;  %v211_v25 = vadd.f32 %v210_v23, %v209_v21 }
  0xd6   :  { %v203_v26 = vadd.f32 %v202_v24, %v201_v22  ;;  %v212_v27 = vrot.slane %v211_v25, 1 }
  0xd8   :  { %v204_v28 = vmul.f32 0.1, %v203_v26  ;;  %v213_v29 = vadd.f32 %v212_v27, %v211_v25 }
  0xda   :  { %v214_v30 = vmul.f32 0.1, %v213_v29  ;;  %v215_v2 = vmul.f32 %v204_v28, %v204_v28  ;;  %v218_v36 = vadd.f32 %v204_v28, %v177_v7 }
  0xdc   :  { %v216_v31 = vsub.f32 %v214_v30, %v215_v2  ;;  %v219_v39 = vperm.slane %v218_v36, 0 }
  0xde   :  { %v217_v32 = vmax.f32 %v216_v31, 0.0  ;;  %v220_v42 = vsub.f32 %v177_v7, %v219_v39  ;;  %v221_v44 = vsub.f32 %v180_v8, %v219_v39 }
  0xe0   :  { %v222_v33 = vadd.f32 1e-05, %v217_v32 }
  0xe2   :  { %295 = vrsqrt.f32 %v222_v33  ;;  %vm229_vm7 = vweird.f32 %v222_v33 }
  0xe8   :  { %v296_v34 = vpop.eup %295 }
  0xe9   :  { %v224_v35 = vmul.f32 %v296_v34, %v222_v33  ;;  %vm230_vm6 = vweird.f32 %v296_v34 }
  0xea   :  { %vm231_vm8 = vmor %vm229_vm7, %vm230_vm6 }
  0xeb   :  { %v225_v37 = vmul.f32 %v296_v34, %v224_v35 }
  0xed   :  { %v226_v38 = vmul.f32 0.5, %v225_v37 }
  0xef   :  { %v227_v40 = vsub.f32 1.5, %v226_v38 }
  0xf1   :  { %v228_v41 = vmul.f32 %v296_v34, %v227_v40 }
  0xf3   :  { %v232_v45 = vsel %vm231_vm8, %v296_v34, %v228_v41 }
  0xf4   :  { %v233_v46 = vmul.f32 %v232_v45, %v220_v42  ;;  %v234_v48 = vmul.f32 %v232_v45, %v221_v44 }
  0xf6   :  { %v239_v49 = vmul.f32 %v290_v43, %v233_v46  ;;  %v240_v51 = vmul.f32 %v290_v43, %v234_v48 }
  0xf8   :  { %v245_v50 = vadd.f32 %v291_v47, %v239_v49  ;;  %v246_v52 = vadd.f32 %v291_v47, %v240_v51 }
  0xfa   :  { %297 = vtanh.f32 %v245_v50 }
  0xfb   :  { %299 = vtanh.f32 %v246_v52 }
 0x100   :  { %v298_v54 = vpop.eup %297 }
 0x101   :  { %v253_v55 = vmul.f32 %v298_v54, %v292_v53  ;;  %v300_v56 = vpop.eup %299 }
 0x102   :  { %v254_v57 = vmul.f32 %v300_v56, %v292_v53 }
 0x103   :  { %255 = vadd.xlane.f32.xlu0 %v253_v55 }
 0x10b   :  { %257 = vadd.xlane.f32.xlu0 %v254_v57 }
 0x176   :  { %v256_v58 = vpop.xlane.xlu0 %255 }
 0x177   :  { %260 = vst.msk [vmem:[%s451_s7] sm:$0xff] %vm259_vm9, %v256_v58 }
 0x17e   :  { %v258_v59 = vpop.xlane.xlu0 %257 }
 0x17f   :  { %261 = vst.msk [vmem:[%s451_s7 + $0x8] sm:$0xff] %vm259_vm9, %v258_v59 }
 0x180   :  { %266 = vsyncpa [#allocation4], 1 }
 0x181   :  { %267 = vsyncpa [#allocation6], 1 }

</bundles_post_ra>
